<compile_context>
chip_gen: v7x
topology: tpu7x:2x2x1
jax: 0.10.0
libtpu: 0.0.40
codegen_flags: <defaults>
</compile_context>

<pallas_src>
import math
from math import pi as PI, lgamma

import numpy as np
import jax
import jax.numpy as jnp
from jax.experimental import pallas as pl
from jax.experimental.pallas import tpu as pltpu

SQRT2 = math.sqrt(2.0)


# ---------------------------------------------------------------------------
# Deterministic parameter construction (numpy, float64) — mirrors the PyTorch
# cache-building helpers, but computed in-script (no .pt files).
# ---------------------------------------------------------------------------
def norm_cm(B):
    Cm = np.zeros(2 * B - 1, dtype=np.float64)
    for m in range(-(B - 1), B):
        Cm[m + (B - 1)] = ((-1.0) ** m) * math.sqrt(2.0 * PI)
    return Cm


def dlt_weights_dh(B):
    W = np.zeros(2 * B, dtype=np.float64)
    for k in range(2 * B):
        C = 2.0 / B * math.sin(PI * (2 * k + 1) / (4.0 * B))
        wk = 0.0
        for p in range(B):
            wk += 1.0 / (2 * p + 1) * math.sin((2 * k + 1) * (2 * p + 1) * PI / (4.0 * B))
        W[k] = C * wk
    return W


def idct_matrix(N):
    DI = np.zeros((N, N), dtype=np.float64)
    for k in range(N):
        for n in range(N):
            DI[k, n] = math.cos(PI * n * (k + 0.5) / N)
    DI[:, 0] *= math.sqrt(1.0 / N)
    DI[:, 1:] *= math.sqrt(2.0 / N)
    return DI


def idst_matrix(N):
    DI = np.zeros((N, N), dtype=np.float64)
    for k in range(N):
        for n in range(N):
            if n == N - 1:
                DI[k, n] = (-1.0) ** k
            else:
                DI[k, n] = math.sin(PI * (n + 1) * (k + 0.5) / N)
    DI[:, N - 1] *= math.sqrt(1.0 / N)
    DI[:, : N - 1] *= math.sqrt(2.0 / N)
    return DI


def tri_half_recur(l, m, n):
    denom = (-1 + l) * math.sqrt((l - m) * (l + m) * (l - n) * (l + n))
    c1 = (1 - 2 * l) * m * n / denom
    c2 = -1.0 * l * math.sqrt(((l - 1) * (l - 1) - m * m) * ((l - 1) * (l - 1) - n * n)) / denom
    return c1, c2


def generate_little_half(B):
    d = np.zeros((B, 2 * B - 1, 2 * B - 1), dtype=np.float64)
    d[0, B - 1, B - 1] = 1.0
    if B > 1:
        d[1, B - 2, B - 2] = 0.5
        d[1, B - 2, B - 1] = 1.0 / SQRT2
        d[1, B - 2, B] = 0.5
        d[1, B - 1, B - 2] = -1.0 / SQRT2
        d[1, B - 1, B] = 1.0 / SQRT2
        d[1, B, B - 2] = 0.5
        d[1, B, B - 1] = -1.0 / SQRT2
        d[1, B, B] = 0.5
    for l in range(2, B):
        for m in range(0, l):
            for n in range(0, l):
                if m == 0 and n == 0:
                    d[l, B - 1, B - 1] = -1.0 * ((l - 1) / l) * d[l - 2, B - 1, B - 1]
                else:
                    c1, c2 = tri_half_recur(l, m, n)
                    d[l, m + (B - 1), n + (B - 1)] = (
                        c1 * d[l - 1, m + (B - 1), n + (B - 1)]
                        + c2 * d[l - 2, m + (B - 1), n + (B - 1)]
                    )
        for m in range(0, l + 1):
            lnV = 0.5 * (lgamma(2 * l + 1) - lgamma(l + m + 1) - lgamma(l - m + 1)) - l * math.log(2.0)
            d[l, m + (B - 1), l + (B - 1)] = math.exp(lnV)
            d[l, l + (B - 1), m + (B - 1)] = ((-1.0) ** (l - m)) * math.exp(lnV)
        for m in range(0, l + 1):
            for n in range(0, l + 1):
                val = d[l, m + (B - 1), n + (B - 1)]
                if m != 0 or n != 0:
                    d[l, -m + (B - 1), -n + (B - 1)] = ((-1.0) ** (m - n)) * val
                    d[l, -m + (B - 1), n + (B - 1)] = ((-1.0) ** (l - n)) * val
                    d[l, m + (B - 1), -n + (B - 1)] = ((-1.0) ** (l + m)) * val
    return d


def wigner_blocks(B):
    """Dense per-m blocks of the sparse Wigner matrix D: shape (2B-1, B, 2B)."""
    d = generate_little_half(B)
    N = 2 * B
    Dblk = np.zeros((2 * B - 1, B, 2 * B), dtype=np.float64)
    for mi, m in enumerate(range(-(B - 1), B)):
        for l in range(abs(m), B):
            for n in range(0, l + 1):
                if m % 2 == 0:
                    if n == 0:
                        c = math.sqrt((2 * l + 1) / 2.0) * math.sqrt(N)
                    else:
                        c = math.sqrt((2 * l + 1) / 2.0) * math.sqrt(2.0 * N)
                    if m % 4 == 2:
                        c *= -1.0
                    coeff = c * d[l, n + (B - 1), -m + (B - 1)] * d[l, n + (B - 1), B - 1]
                elif n == l:
                    coeff = 0.0
                else:
                    c = math.sqrt((2 * l + 1) / 2.0) * math.sqrt(2.0 * N)
                    if m % 4 == 1:
                        c *= -1.0
                    coeff = c * d[l, n + 1 + (B - 1), -m + (B - 1)] * d[l, n + 1 + (B - 1), B - 1]
                Dblk[mi, l, n] = coeff
    return Dblk


def build_fused_weight(B, Cm, XFc, XFs, Dblk):
    """Block-diagonal fused weight W_bd (M*N, M*B), float64.

    out[b, m, l] = sum_k psi[b, m, k] * W_bd[m*N + k, m*B + l]
    with the m-th block = Cm[m] * XF_{dct|dst} @ Dblk[m].T  (all host-side f64).
    """
    M, N = 2 * B - 1, 2 * B
    dct_on_odd = (B - 1) % 2 == 1          # matches the PyTorch cInd/sInd logic
    Wbd = np.zeros((M * N, M * B), dtype=np.float64)
    for mi in range(M):
        use_dct = (mi % 2 == 1) if dct_on_odd else (mi % 2 == 0)
        XF = XFc if use_dct else XFs
        Wm = Cm[mi] * (XF @ Dblk[mi].T)    # (N, B)
        Wbd[mi * N:(mi + 1) * N, mi * B:(mi + 1) * B] = Wm
    return Wbd


# ---------------------------------------------------------------------------
# Pallas kernel: the whole transform is one MXU matmul on lane-dense operands.
#   psi_flat (b, M*N) @ W_bd (M*N, M*B) -> out_flat (b, M*B)
# ---------------------------------------------------------------------------
def _fdlt_kernel(psi_ref, w_ref, out_ref):
    out_ref[...] = jnp.dot(
        psi_ref[...], w_ref[...], preferred_element_type=jnp.float32
    ).astype(out_ref.dtype)


def fdlt_forward(psiHat, W_bd, B):
    """psiHat: (b, 2B-1, 2B) -> (b, 2B-1, B), matching the PyTorch module."""
    b, M, N = psiHat.shape
    assert M == 2 * B - 1 and N == 2 * B

    # Row-major merges only (no transposes / HBM relayouts).
    psi_flat = psiHat.reshape(b, M * N)

    out_flat = pl.pallas_call(
        _fdlt_kernel,
        out_shape=jax.ShapeDtypeStruct((b, M * B), psiHat.dtype),
        grid=(1,),
        in_specs=[
            pl.BlockSpec((b, M * N), lambda i: (0, 0)),        # full psi slab
            pl.BlockSpec((M * N, M * B), lambda i: (0, 0)),    # fused weight
        ],
        out_specs=pl.BlockSpec((b, M * B), lambda i: (0, 0)),  # lane-dense output slab
        compiler_params=pltpu.CompilerParams(
            dimension_semantics=("parallel",),
        ),
    )(psi_flat, W_bd)

    return out_flat.reshape(b, M, B)


if __name__ == "__main__":
    B = 8          # bandwidth
    b = 2          # batch
    M = 2 * B - 1
    N = 2 * B

    key = jax.random.PRNGKey(0)
    psiHat = jax.random.normal(key, (b, M, N), dtype=jnp.float32)

    # Deterministic "parameters" (same math as module __init__/reset_parameters),
    # fused on the host in float64.
    Cm_np = norm_cm(B)
    W_np = dlt_weights_dh(B)
    XFc_np = np.diag(W_np) @ idct_matrix(N)     # dct(x) = x @ XFc  (nn.Linear w = XF.T)
    XFs_np = np.diag(W_np) @ idst_matrix(N)     # dst(x) = x @ XFs
    Dblk_np = wigner_blocks(B)                  # (2B-1, B, 2B) dense per-m blocks of sparse D
    Wbd_np = build_fused_weight(B, Cm_np, XFc_np, XFs_np, Dblk_np)  # (M*N, M*B)

    out = fdlt_forward(psiHat, jnp.asarray(Wbd_np, jnp.float32), B)
    out = jax.block_until_ready(out)
    assert out.shape == (b, M, B), out.shape

    # Pure-numpy float64 reference of the PyTorch forward (unfused path).
    psi_np = np.asarray(psiHat, dtype=np.float64)
    x = Cm_np[None, :, None] * psi_np
    if (B - 1) % 2 == 1:
        cInd = np.arange(1, M, 2); sInd = np.arange(0, M, 2)
    else:
        sInd = np.arange(1, M, 2); cInd = np.arange(0, M, 2)
    xp = np.empty_like(x)
    xp[:, cInd, :] = x[:, cInd, :] @ XFc_np
    xp[:, sInd, :] = x[:, sInd, :] @ XFs_np
    ref = np.einsum('bmn,mln->bml', xp, Dblk_np)          # (b, 2B-1, B)

    # 1) The host-side constant fusion is mathematically exact (f64 vs f64).
    ref_fused = (psi_np.reshape(b, M * N) @ Wbd_np).reshape(b, M, B)
    np.testing.assert_allclose(ref_fused, ref, rtol=1e-10, atol=1e-10)

    # 2) Kernel vs f64 reference. Default matmul precision performs the f32
    #    dot as a single bf16 MXU pass (per perf guidance, instead of the 6x
    #    decomposition of Precision.HIGHEST), so use a correspondingly looser
    #    tolerance than an exact-f32 check.
    np.testing.assert_allclose(np.asarray(out, np.float64), ref, rtol=5e-2, atol=5e-2)

    print("KERNEL_OK")
</pallas_src>

<mosaic_0001>
module attributes {stable_mosaic.version = 11 : i64} {
  func.func @_fdlt_kernel(%arg0: i32, %arg1: memref<2x240xf32, #tpu.memory_space<vmem>>, %arg2: memref<240x120xf32, #tpu.memory_space<vmem>>, %arg3: memref<2x120xf32, #tpu.memory_space<vmem>>) attributes {dimension_semantics = [#tpu.dimension_semantics<parallel>], iteration_bounds = array<i64: 1>, scalar_prefetch = 0 : i64, scratch_operands = 0 : i64, tpu.core_type = #tpu.core_type<tc>, window_params = [{pipeline_mode = #tpu.pipeline_mode<synchronous>, transform_indices = @transform_0, window_bounds = array<i64: 2, 240>}, {pipeline_mode = #tpu.pipeline_mode<synchronous>, transform_indices = @transform_1, window_bounds = array<i64: 240, 120>}, {pipeline_mode = #tpu.pipeline_mode<synchronous>, transform_indices = @transform_2, window_bounds = array<i64: 2, 120>}]} {
    %c0 = arith.constant 0 : index
    %c0_0 = arith.constant 0 : index
    %0 = vector.load %arg1[%c0, %c0_0] : memref<2x240xf32, #tpu.memory_space<vmem>>, vector<2x240xf32>
    %c0_1 = arith.constant 0 : index
    %c0_2 = arith.constant 0 : index
    %1 = vector.load %arg2[%c0_1, %c0_2] : memref<240x120xf32, #tpu.memory_space<vmem>>, vector<240x120xf32>
    %cst = arith.constant dense<0.000000e+00> : vector<2x120xf32>
    %2 = tpu.matmul %0, %1, %cst {dimension_numbers = #tpu.dot_dimension_numbers<[1], [0], [0], [1], [0, 0, 1, 1], [], []>} : vector<2x240xf32>, vector<240x120xf32>, vector<2x120xf32> -> vector<2x120xf32>
    %c0_3 = arith.constant 0 : index
    %c0_4 = arith.constant 0 : index
    %3 = vector.load %arg3[%c0_3, %c0_4] : memref<2x120xf32, #tpu.memory_space<vmem>>, vector<2x120xf32>
    tpu.vector_store %arg3[%c0_3, %c0_4], %2 {strides = array<i32>} : memref<2x120xf32, #tpu.memory_space<vmem>>, vector<2x120xf32>,
    return
  }
  func.func @transform_0(%arg0: i32) -> (i32, i32) {
    %c0_i32 = arith.constant 0 : i32
    %c0_i32_0 = arith.constant 0 : i32
    %c0_i32_1 = arith.constant 0 : i32
    return %c0_i32, %c0_i32_0 : i32, i32
  }
  func.func @transform_1(%arg0: i32) -> (i32, i32) {
    %c0_i32 = arith.constant 0 : i32
    %c0_i32_0 = arith.constant 0 : i32
    %c0_i32_1 = arith.constant 0 : i32
    return %c0_i32, %c0_i32_0 : i32, i32
  }
  func.func @transform_2(%arg0: i32) -> (i32, i32) {
    %c0_i32 = arith.constant 0 : i32
    %c0_i32_0 = arith.constant 0 : i32
    %c0_i32_1 = arith.constant 0 : i32
    return %c0_i32, %c0_i32_0 : i32, i32
  }
}

</mosaic_0001>

<bundles_post_ra>
// kernel: tpu_custom_call.1
= control target key start
LH: loop header
LB: loop body
LE: loop exit
PB: predicated region body
PF: predicated region fallthrough
CT: control target
= control target key end

     0   :  { %7 = vsyncpa [#allocation3], 0  ;;  %s374_s0 = inlined_call_operand.hbm [shape: f32[2,240], index: 0, kind: input, shape index: {}]   ;;  %s375_s1 = inlined_call_operand.hbm [shape: f32[240,120], index: 1, kind: input, shape index: {}]   ;;  %s376_s2 = inlined_call_operand.hbm [shape: f32[2,120], index: 2, kind: output, shape index: {}]  }
   0x1   :  { %8 = vsyncpa [#allocation6], 0 }
   0x2   :  { %9 = vsyncpa [#allocation4], 0  ;;  %s295_s9 = smov [#allocation2]   ;;  %s296_s11 = smov [#allocation5]  }
   0x3   :  { %s16_s10 = sshll.u32 %s295_s9, 4  ;;  %s25_s12 = sshll.u32 %s296_s11, 4  ;;  %s17_s10 = int_to_ptr.vmem [resolvable:$true] %s16_s10  ;;  %s316_s12 = int_to_ptr.vmem [resolvable:$true] %s25_s12 }
   0x4   :  { %s223_s15 = scalar_lea.hbm %s374_s0, 64 }
   0x5   :  { %p224_p0 = scmp.ne.s32.totalorder %s374_s0, %s223_s15  ;;  %p227_p1 = scmp.lt.u32.totalorder %s223_s15, %s374_s0 }
   0x7   :  { %p229_p2 = pnand %p227_p1, %p224_p0 }
   0x9   :  { %232 = shalt.err (!%p229_p2)
}
   0xa   :  { %s233_s20 = scalar_lea.vmem %s17_s10, 64  ;;  %p238_p4 = scmp.lt.s32.totalorder %s17_s10, %s17_s10 }
   0xb   :  { %p234_p3 = scmp.ne.s32.totalorder %s17_s10, %s233_s20  ;;  %p239_p5 = scmp.lt.s32.totalorder %s233_s20, %s233_s20 }
   0xd   :  { %p240_p6 = por %p239_p5, %p238_p4 }
   0xf   :  { %p241_p7 = pnand %p240_p6, %p234_p3 }
  0x11   :  { %244 = shalt.err (!%p241_p7)
}
  0x12   :  { %19 = dma.hbm_to_vmem [thread:$0]  %s374_s0, 64, %s17_s10, [#allocation3]  }
  0x13   :  { %s245_s25 = scalar_lea.hbm %s375_s1, 3840 }
  0x14   :  { %p246_p8 = scmp.ne.s32.totalorder %s375_s1, %s245_s25  ;;  %p249_p9 = scmp.lt.u32.totalorder %s245_s25, %s375_s1 }
  0x16   :  { %p251_p10 = pnand %p249_p9, %p246_p8 }
  0x18   :  { %254 = shalt.err (!%p251_p10)
}
  0x19   :  { %s255_s30 = scalar_lea.vmem %s316_s12, 3840  ;;  %p260_p12 = scmp.lt.s32.totalorder %s316_s12, %s316_s12 }
  0x1a   :  { %p256_p11 = scmp.ne.s32.totalorder %s316_s12, %s255_s30  ;;  %p261_p13 = scmp.lt.s32.totalorder %s255_s30, %s255_s30 }
  0x1c   :  { %p262_p0 = por %p261_p13, %p260_p12 }
  0x1e   :  { %p263_p1 = pnand %p262_p0, %p256_p11 }
  0x20   :  { %266 = shalt.err (!%p263_p1)
}
  0x21   :  { %s297_s0 = smov 128   ;;  %s298_s3 = smov 8  }
  0x22   :  { %31 = dma.hbm_to_vmem [thread:$0]  %s375_s1, 3840, %s316_s12, [#allocation6], %s297_s0, %s297_s0, %s298_s3  }
  0x23   :  { %289 = dma.done.wait [#allocation3], 64  }
  0x24   :  { %290 = vsyncadd [#allocation3], 4294967232 }
  0x25   :  { %291 = dma.done.wait [#allocation6], 3840  }
  0x26   :  { %292 = vsyncadd [#allocation6], 4294963456  ;;  %v299_v0 = vmov 0.0|0.0   ;;  %v39_v1 = vld [vmem:[#allocation5] sm:$0xff]  ;;  %v40_v2 = vld [vmem:[#allocation5 + $0x8] sm:$0xff]  ;;  %vm79_vm0 = vcmask 916480  }
  0x27   :  { %172 = vmatprep.subr.bf16.mxu0 %v299_v0  ;;  %v41_v3 = vld [vmem:[#allocation5 + $0x10] sm:$0xff]  ;;  %v173_v4 = vpack.c.bf16 %v40_v2, %v39_v1  ;;  %v42_v5 = vld [vmem:[#allocation5 + $0x18] sm:$0xff]  ;;  %v43_v7 = vld [vmem:[#allocation5 + $0x20] sm:$0xff]  ;;  %s300_s1 = smov [#allocation7]   ;;  %vm152_vm1 = vcmask 975872  }
  0x28   :  { %v176_v6 = vpack.c.bf16 %v42_v5, %v41_v3  ;;  %v44_v8 = vld [vmem:[#allocation5 + $0x28] sm:$0xff]  ;;  %v45_v10 = vld [vmem:[#allocation5 + $0x30] sm:$0xff]  ;;  %v46_v11 = vld [vmem:[#allocation5 + $0x38] sm:$0xff]  ;;  %s160_s6 = sshll.u32 %s300_s1, 4  ;;  %s161_s6 = int_to_ptr.vmem [resolvable:$true] %s160_s6 }
  0x29   :  { %174 = vmatpush1.bf16.msra.mxu0 %v173_v4  ;;  %v179_v9 = vpack.c.bf16 %v44_v8, %v43_v7  ;;  %v170_v12 = vld.sshfl [vmem:[#allocation2] sm:$0x33 pattern:$0x76325410]  ;;  %v182_v13 = vpack.c.bf16 %v46_v11, %v45_v10  ;;  %v47_v15 = vld [vmem:[#allocation5 + $0x40] sm:$0xff]  ;;  %v48_v16 = vld [vmem:[#allocation5 + $0x48] sm:$0xff]  ;;  %p272_p3 = scmp.lt.s32.totalorder %s161_s6, %s161_s6 }
  0x2a   :  { %175 = vmatprep.subr.bf16.mxu0 %v299_v0  ;;  %v77_v14 = vcombine.high %v170_v12, %v170_v12  ;;  %v185_v17 = vpack.c.bf16 %v48_v16, %v47_v15  ;;  %v49_v18 = vld [vmem:[#allocation5 + $0x50] sm:$0xff]  ;;  %v50_v19 = vld [vmem:[#allocation5 + $0x58] sm:$0xff]  ;;  %v51_v21 = vld [vmem:[#allocation5 + $0x60] sm:$0xff]  ;;  %s267_s7 = scalar_lea.vmem %s161_s6, 32 }
  0x2b   :  { %v188_v20 = vpack.c.bf16 %v50_v19, %v49_v18  ;;  %v52_v22 = vld [vmem:[#allocation5 + $0x68] sm:$0xff]  ;;  %v53_v24 = vld [vmem:[#allocation5 + $0x70] sm:$0xff]  ;;  %v54_v25 = vld [vmem:[#allocation5 + $0x78] sm:$0xff]  ;;  %p268_p2 = scmp.ne.s32.totalorder %s161_s6, %s267_s7  ;;  %p273_p4 = scmp.lt.s32.totalorder %s267_s7, %s267_s7 }
  0x2c   :  { %171 = vmatprep.mubr.msk.f32.mxu0 %vm79_vm0, %v77_v14  ;;  %v191_v23 = vpack.c.bf16 %v52_v22, %v51_v21  ;;  %v194_v26 = vpack.c.bf16 %v54_v25, %v53_v24  ;;  %v55_v27 = vld [vmem:[#allocation5 + $0x80] sm:$0xff]  ;;  %v56_v28 = vld [vmem:[#allocation5 + $0x88] sm:$0xff]  ;;  %v57_v30 = vld [vmem:[#allocation5 + $0x90] sm:$0xff] }
  0x2d   :  { %177 = vmatpush1.bf16.msra.mxu0 %v176_v6  ;;  %v197_v29 = vpack.c.bf16 %v56_v28, %v55_v27  ;;  %v58_v31 = vld [vmem:[#allocation5 + $0x98] sm:$0xff]  ;;  %v59_v33 = vld [vmem:[#allocation5 + $0xa0] sm:$0xff]  ;;  %v60_v34 = vld [vmem:[#allocation5 + $0xa8] sm:$0xff]  ;;  %p274_p5 = por %p273_p4, %p272_p3 }
  0x2e   :  { %178 = vmatprep.subr.bf16.mxu0 %v299_v0  ;;  %v200_v32 = vpack.c.bf16 %v58_v31, %v57_v30  ;;  %v203_v35 = vpack.c.bf16 %v60_v34, %v59_v33  ;;  %v61_v36 = vld [vmem:[#allocation5 + $0xb0] sm:$0xff]  ;;  %v62_v37 = vld [vmem:[#allocation5 + $0xb8] sm:$0xff]  ;;  %v63_v39 = vld [vmem:[#allocation5 + $0xc0] sm:$0xff] }
  0x2f   :  { %v206_v38 = vpack.c.bf16 %v62_v37, %v61_v36  ;;  %v64_v40 = vld [vmem:[#allocation5 + $0xc8] sm:$0xff]  ;;  %v65_v42 = vld [vmem:[#allocation5 + $0xd0] sm:$0xff]  ;;  %v66_v43 = vld [vmem:[#allocation5 + $0xd8] sm:$0xff]  ;;  %p275_p6 = pnand %p274_p5, %p268_p2 }
  0x30   :  { %v209_v41 = vpack.c.bf16 %v64_v40, %v63_v39  ;;  %v212_v44 = vpack.c.bf16 %v66_v43, %v65_v42  ;;  %v67_v45 = vld [vmem:[#allocation5 + $0xe0] sm:$0xff]  ;;  %v68_v46 = vld [vmem:[#allocation5 + $0xe8] sm:$0xff] }
  0x31   :  { %180 = vmatpush1.bf16.msra.mxu0 %v179_v9  ;;  %v215_v47 = vpack.c.bf16 %v68_v46, %v67_v45 }
  0x32   :  { %181 = vmatprep.subr.bf16.mxu0 %v299_v0 }
  0x35   :  { %183 = vmatpush1.bf16.msra.mxu0 %v182_v13 }
  0x36   :  { %184 = vmatprep.subr.bf16.mxu0 %v299_v0 }
  0x39   :  { %186 = vmatpush1.bf16.msra.mxu0 %v185_v17 }
  0x3a   :  { %187 = vmatprep.subr.bf16.mxu0 %v299_v0 }
  0x3d   :  { %189 = vmatpush1.bf16.msra.mxu0 %v188_v20 }
  0x3e   :  { %190 = vmatprep.subr.bf16.mxu0 %v299_v0 }
  0x41   :  { %192 = vmatpush1.bf16.msra.mxu0 %v191_v23 }
  0x42   :  { %193 = vmatprep.subr.bf16.mxu0 %v299_v0 }
  0x45   :  { %195 = vmatpush1.bf16.msra.mxu0 %v194_v26 }
  0x46   :  { %196 = vmatprep.subr.bf16.mxu0 %v299_v0 }
  0x49   :  { %198 = vmatpush1.bf16.msra.mxu0 %v197_v29 }
  0x4a   :  { %199 = vmatprep.subr.bf16.mxu0 %v299_v0 }
  0x4d   :  { %201 = vmatpush1.bf16.msra.mxu0 %v200_v32 }
  0x4e   :  { %202 = vmatprep.subr.bf16.mxu0 %v299_v0 }
  0x51   :  { %204 = vmatpush1.bf16.msra.mxu0 %v203_v35 }
  0x52   :  { %205 = vmatprep.subr.bf16.mxu0 %v299_v0 }
  0x55   :  { %207 = vmatpush1.bf16.msra.mxu0 %v206_v38 }
  0x56   :  { %208 = vmatprep.subr.bf16.mxu0 %v299_v0 }
  0x59   :  { %210 = vmatpush1.bf16.msra.mxu0 %v209_v41 }
  0x5a   :  { %211 = vmatprep.subr.bf16.mxu0 %v299_v0 }
  0x5d   :  { %213 = vmatpush1.bf16.msra.mxu0 %v212_v44 }
  0x5e   :  { %214 = vmatprep.subr.bf16.mxu0 %v299_v0 }
  0x61   :  { %216 = vmatpush1.bf16.msra.mxu0 %v215_v47 }
  0x64   :  { %147 = vmatmul.mubr.f32.vlgmr.msra.gmra.mrb[0].mxu0 %v170_v12 }
 0x137   :  { %v148_v48 = vpop.f32.mrb[0].mxu0 }
 0x138   :  { %v150_v49 = vpop.f32.mrb[1].mxu0  ;;  %153 = vst.msk [vmem:[#allocation7] sm:$0x3] %vm152_vm1, %v148_v48 }
 0x139   :  { %278 = shalt.err (!%p275_p6)
}
 0x13a   :  { %s279_s10 = scalar_lea.hbm %s376_s2, 32 }
 0x13b   :  { %p280_p7 = scmp.ne.s32.totalorder %s376_s2, %s279_s10  ;;  %p283_p8 = scmp.lt.u32.totalorder %s279_s10, %s376_s2 }
 0x13d   :  { %p285_p9 = pnand %p283_p8, %p280_p7 }
 0x13f   :  { %288 = shalt.err (!%p285_p9)
}
 0x140   :  { %163 = dma.vmem_to_hbm [thread:$0]  %s161_s6, 32, %s376_s2, [#allocation4]  }
 0x141   :  { %293 = dma.done.wait [#allocation4], 32  }
 0x142   :  { %294 = vsyncadd [#allocation4], 4294967264 }
 0x143   :  { %167 = vsyncpa [#allocation3], 1 }
 0x144   :  { %168 = vsyncpa [#allocation6], 1 }
 0x145   :  { %169 = vsyncpa [#allocation4], 1 }

</bundles_post_ra>
